<compile_context>
chip_gen: v5e
topology: v5e:2x2
jax: 0.10.0
libtpu: 0.0.40
codegen_flags: <defaults>
</compile_context>

<pallas_src>
import functools

import jax
import jax.numpy as jnp
import numpy as np
from jax.experimental import pallas as pl
from jax.experimental.pallas import tpu as pltpu


# ---------------------------------------------------------------------------
# Kernel
# ---------------------------------------------------------------------------
def critic_kernel(sa_ref, w1_ref, w2_ref, w5_ref, w36_ref, b_ref, q_ref, *,
                  ew_dtype):
    H = w2_ref.shape[0]            # hidden width (256)
    cdt = w2_ref.dtype             # compute dtype fed to the MXU

    # ---- Layer 1 (both heads fused, concat-free input): (TB, 2H) ----
    h14 = jnp.dot(sa_ref[...], w1_ref[...],
                  preferred_element_type=jnp.float32) + b_ref[0:1, :]
    h14 = jnp.maximum(h14.astype(ew_dtype), 0)

    h = h14[:, :H].astype(cdt)     # Q1 chain
    g = h14[:, H:].astype(cdt)     # Q2 chain (independent -> interleaves)

    # ---- Layer 2: two 256x256 matmuls kept in one basic block ----
    h2 = jnp.maximum(
        (jnp.dot(h, w2_ref[...], preferred_element_type=jnp.float32)
         + b_ref[1:2, :H]).astype(ew_dtype), 0).astype(cdt)
    g2 = jnp.maximum(
        (jnp.dot(g, w5_ref[...], preferred_element_type=jnp.float32)
         + b_ref[1:2, H:]).astype(ew_dtype), 0).astype(cdt)

    # ---- Output layer: block-diagonal (2H, 2) -> single (TB, 2) store ----
    # w36[:H, 0] = W3, w36[H:, 1] = W6, off-block entries are exactly zero,
    # so the sum below is exact: col 0 = q1, col 1 = q2.
    q = (jnp.dot(h2, w36_ref[:H, :], preferred_element_type=jnp.float32)
         + jnp.dot(g2, w36_ref[H:, :], preferred_element_type=jnp.float32)
         + b_ref[2:3, 0:2])
    q_ref[...] = q.astype(q_ref.dtype)


# ---------------------------------------------------------------------------
# Wrapper helpers
# ---------------------------------------------------------------------------
def _round_up(x, m):
    return ((x + m - 1) // m) * m


def _cdiv(a, b):
    return -(-a // b)


def _choose_tiles(batch, block_b, min_rows_for_split=512):
    """Pick (TB, B_pad) without the ~2x padding blowup of round_up(B, block_b).

    Tile count is chosen first, then TB = round_up(ceil(B8 / n), 8); a single
    big tile is split in two so v7x's second TensorCore gets work.
    """
    b8 = _round_up(max(batch, 1), 8)
    n = max(1, _cdiv(b8, max(block_b, 8)))
    if n == 1 and b8 >= min_rows_for_split:
        n = 2                                  # let megacore shard the batch
    tb = _round_up(_cdiv(b8, n), 8)
    return tb, n * tb


def _default_elementwise_dtype(compute_dtype):
    """bf16 elementwise only where the VPU has bf16 (v6e / v7x)."""
    if np.dtype(compute_dtype) == np.dtype(np.float32):
        return jnp.float32
    try:
        kind = jax.devices()[0].device_kind.lower()
    except Exception:
        return jnp.float32
    if "v6" in kind or "v7" in kind:
        return compute_dtype
    return jnp.float32                          # v5e & older: f32 VALU path


def _resident_spec(shape, single_buffer):
    """BlockSpec for a grid-invariant (weight/bias) operand."""
    idx = lambda i: (0,) * len(shape)
    if single_buffer and hasattr(pl, "Buffered"):
        try:
            return pl.BlockSpec(shape, idx, pipeline_mode=pl.Buffered(1))
        except TypeError:
            pass
    return pl.BlockSpec(shape, idx)


# ---------------------------------------------------------------------------
# Forward
# ---------------------------------------------------------------------------
def critic_forward(state, action, packed_params, *, block_b=1024,
                   compute_dtype=jnp.bfloat16, elementwise_dtype=None,
                   single_buffer_weights=True):
    """Twin-Q forward. state: (B, S), action: (B, A). Returns (q1, q2), each (B, 1)."""
    w14, w2, w5, w36, bpack = packed_params
    B = state.shape[0]
    SA = w14.shape[0]
    H = w2.shape[0]
    assert state.shape[1] + action.shape[1] == SA

    cdt = compute_dtype
    ew = (elementwise_dtype if elementwise_dtype is not None
          else _default_elementwise_dtype(cdt))

    # Fused (B, S+A) input; the torch.cat is a trivial XLA fusion, no kernel
    # concat needed.
    sa = jnp.concatenate([state, action], axis=1).astype(cdt)

    TB, B_pad = _choose_tiles(B, block_b)
    if B_pad != B:
        sa = jnp.pad(sa, ((0, B_pad - B), (0, 0)))

    w14c, w2c, w5c, w36c = (w.astype(cdt) for w in (w14, w2, w5, w36))
    # Packed biases stay f32: they are added to the f32 MXU accumulator.

    kernel = functools.partial(critic_kernel, ew_dtype=ew)
    q = pl.pallas_call(
        kernel,
        out_shape=jax.ShapeDtypeStruct((B_pad, 2), jnp.float32),
        grid=(B_pad // TB,),
        in_specs=[
            pl.BlockSpec((TB, SA), lambda i: (i, 0)),                   # sa tile
            _resident_spec((SA, 2 * H), single_buffer_weights),         # W1|W4
            _resident_spec((H, H), single_buffer_weights),              # W2
            _resident_spec((H, H), single_buffer_weights),              # W5
            _resident_spec((2 * H, 2), single_buffer_weights),          # W3/W6 blkdiag
            _resident_spec((3, 2 * H), single_buffer_weights),          # biases
        ],
        out_specs=pl.BlockSpec((TB, 2), lambda i: (i, 0)),
        compiler_params=pltpu.CompilerParams(
            dimension_semantics=("parallel",),
            vmem_limit_bytes=32 * 1024 * 1024),
    )(sa, w14c, w2c, w5c, w36c, bpack)

    q = q[:B]
    return q[:, 0:1], q[:, 1:2]


# ---------------------------------------------------------------------------
# Parameter init (mirrors orthogonal_init: orthogonal weight, constant-0 bias)
# and packing into the fused kernel layout.
# ---------------------------------------------------------------------------
def init_critic_raw_params(key, state_dim, action_dim, hidden=256,
                           bias_scale=0.0):
    """12 per-layer tensors in (in, out) layout. bias_scale=0 matches the
    PyTorch orthogonal_init spec; a nonzero value lets tests exercise the
    bias path."""
    dims = [
        (hidden, state_dim + action_dim),  # l1
        (hidden, hidden),                  # l2
        (1, hidden),                       # l3
        (hidden, state_dim + action_dim),  # l4
        (hidden, hidden),                  # l5
        (1, hidden),                       # l6
    ]
    ortho = jax.nn.initializers.orthogonal(scale=1.0)
    params = []
    for (out_f, in_f) in dims:
        key, kw, kb = jax.random.split(key, 3)
        w_torch = ortho(kw, (out_f, in_f), jnp.float32)   # PyTorch (out, in)
        w = jnp.transpose(w_torch)                        # (in, out) for x @ W
        b = bias_scale * jax.random.normal(kb, (out_f,), jnp.float32)
        params.extend([w, b])
    return tuple(params)


def pack_critic_params(raw_params, hidden=256):
    """Pack the 12 per-layer tensors into the 5 fused kernel operands."""
    (w1, b1, w2, b2, w3, b3, w4, b4, w5, b5, w6, b6) = raw_params
    H = hidden
    # Fused layer-1 weight (S+A, 2H): cols [0,H) = W1 (Q1), cols [H,2H) = W4 (Q2).
    w14 = jnp.concatenate([w1, w4], axis=1)
    # Block-diagonal output weight (2H, 2): col 0 <- W3, col 1 <- W6.
    w36 = jnp.zeros((2 * H, 2), jnp.float32)
    w36 = w36.at[:H, 0].set(w3[:, 0]).at[H:, 1].set(w6[:, 0])
    # Bias pack (3, 2H): row0 = b1|b4 ; row1 = b2|b5 ; row2 = [b3, b6, 0...].
    bpack = jnp.zeros((3, 2 * H), jnp.float32)
    bpack = bpack.at[0, :].set(jnp.concatenate([b1, b4]))
    bpack = bpack.at[1, :].set(jnp.concatenate([b2, b5]))
    bpack = bpack.at[2, 0].set(b3[0]).at[2, 1].set(b6[0])
    return (w14, w2, w5, w36, bpack)


# Pure-JAX reference (mirrors the PyTorch forward) for correctness checking.
def critic_ref(state, action, raw_params):
    (w1, b1, w2, b2, w3, b3, w4, b4, w5, b5, w6, b6) = raw_params
    sa = jnp.concatenate([state, action], axis=1)
    h = jnp.maximum(sa @ w1 + b1, 0.0)
    h = jnp.maximum(h @ w2 + b2, 0.0)
    q1 = h @ w3 + b3
    g = jnp.maximum(sa @ w4 + b4, 0.0)
    g = jnp.maximum(g @ w5 + b5, 0.0)
    q2 = g @ w6 + b6
    return q1, q2


if __name__ == "__main__":
    key = jax.random.PRNGKey(0)
    k_state, k_action, k_params = jax.random.split(key, 3)

    batch = 8
    state_dim = 12
    action_dim = 4
    hidden = 256

    state = jax.random.normal(k_state, (batch, state_dim), jnp.float32)
    action = jax.random.normal(k_action, (batch, action_dim), jnp.float32)

    # Small nonzero biases so the packed-bias path is actually exercised.
    raw = init_critic_raw_params(k_params, state_dim, action_dim,
                                 hidden=hidden, bias_scale=0.01)
    packed = pack_critic_params(raw, hidden=hidden)
    r1, r2 = critic_ref(state, action, raw)

    # --- Default (bf16 MXU) path: loose tolerance vs f32 reference. ---
    q1, q2 = critic_forward(state, action, packed)
    q1 = jax.block_until_ready(q1)
    q2 = jax.block_until_ready(q2)
    assert q1.shape == (batch, 1) and q2.shape == (batch, 1)
    assert jnp.allclose(q1, r1, atol=5e-2, rtol=5e-2)
    assert jnp.allclose(q2, r2, atol=5e-2, rtol=5e-2)

    # --- f32 parity path: tight tolerance. ---
    p1, p2 = critic_forward(state, action, packed,
                            compute_dtype=jnp.float32)
    p1 = jax.block_until_ready(p1)
    assert jnp.allclose(p1, r1, atol=1e-4, rtol=1e-4)
    assert jnp.allclose(p2, r2, atol=1e-4, rtol=1e-4)

    # --- Multi-tile grid + padding path (small block_b forces 3 grid steps). ---
    batch2 = 40
    s2 = jax.random.normal(jax.random.PRNGKey(1), (batch2, state_dim), jnp.float32)
    a2 = jax.random.normal(jax.random.PRNGKey(2), (batch2, action_dim), jnp.float32)
    g1, g2 = critic_forward(s2, a2, packed, block_b=16,
                            compute_dtype=jnp.float32)
    g1 = jax.block_until_ready(g1)
    gr1, gr2 = critic_ref(s2, a2, raw)
    assert g1.shape == (batch2, 1) and g2.shape == (batch2, 1)
    assert jnp.allclose(g1, gr1, atol=1e-4, rtol=1e-4)
    assert jnp.allclose(g2, gr2, atol=1e-4, rtol=1e-4)

    print("KERNEL_OK")
</pallas_src>

<mosaic_0001>
module attributes {stable_mosaic.version = 11 : i64} {
  func.func @critic_kernel(%arg0: i32, %arg1: memref<8x16xbf16, #tpu.memory_space<vmem>>, %arg2: memref<16x512xbf16, #tpu.memory_space<vmem>>, %arg3: memref<256x256xbf16, #tpu.memory_space<vmem>>, %arg4: memref<256x256xbf16, #tpu.memory_space<vmem>>, %arg5: memref<512x2xbf16, #tpu.memory_space<vmem>>, %arg6: memref<3x512xf32, #tpu.memory_space<vmem>>, %arg7: memref<8x2xf32, #tpu.memory_space<vmem>>) attributes {dimension_semantics = [#tpu.dimension_semantics<parallel>], iteration_bounds = array<i64: 1>, scalar_prefetch = 0 : i64, scratch_operands = 0 : i64, tpu.core_type = #tpu.core_type<tc>, window_params = [{transform_indices = @transform_0, window_bounds = array<i64: 8, 16>}, {pipeline_mode = #tpu.pipeline_mode<synchronous>, transform_indices = @transform_1, window_bounds = array<i64: 16, 512>}, {pipeline_mode = #tpu.pipeline_mode<synchronous>, transform_indices = @transform_2, window_bounds = array<i64: 256, 256>}, {pipeline_mode = #tpu.pipeline_mode<synchronous>, transform_indices = @transform_3, window_bounds = array<i64: 256, 256>}, {pipeline_mode = #tpu.pipeline_mode<synchronous>, transform_indices = @transform_4, window_bounds = array<i64: 512, 2>}, {pipeline_mode = #tpu.pipeline_mode<synchronous>, transform_indices = @transform_5, window_bounds = array<i64: 3, 512>}, {transform_indices = @transform_6, window_bounds = array<i64: 8, 2>}]} {
    %c0 = arith.constant 0 : index
    %c0_0 = arith.constant 0 : index
    %0 = vector.load %arg1[%c0, %c0_0] : memref<8x16xbf16, #tpu.memory_space<vmem>>, vector<8x16xbf16>
    %c0_1 = arith.constant 0 : index
    %c0_2 = arith.constant 0 : index
    %1 = vector.load %arg2[%c0_1, %c0_2] : memref<16x512xbf16, #tpu.memory_space<vmem>>, vector<16x512xbf16>
    %cst = arith.constant dense<0.000000e+00> : vector<8x512xf32>
    %2 = tpu.matmul %0, %1, %cst {dimension_numbers = #tpu.dot_dimension_numbers<[1], [0], [0], [1], [0, 0, 1, 1], [], []>} : vector<8x16xbf16>, vector<16x512xbf16>, vector<8x512xf32> -> vector<8x512xf32>
    %c0_3 = arith.constant 0 : index
    %c0_4 = arith.constant 0 : index
    %3 = vector.load %arg6[%c0_3, %c0_4] : memref<3x512xf32, #tpu.memory_space<vmem>>, vector<1x512xf32>
    %4 = vector.broadcast %3 : vector<1x512xf32> to vector<8x512xf32>
    %5 = arith.addf %2, %4 : vector<8x512xf32>
    %cst_5 = arith.constant 0.000000e+00 : f32
    %6 = vector.broadcast %cst_5 : f32 to vector<8x512xf32>
    %7 = arith.maximumf %5, %6 : vector<8x512xf32>
    %8 = vector.extract_strided_slice %7 {offsets = [0, 0], sizes = [8, 256], strides = [1, 1]} : vector<8x512xf32> to vector<8x256xf32>
    %9 = arith.truncf %8 : vector<8x256xf32> to vector<8x256xbf16>
    %10 = vector.extract_strided_slice %7 {offsets = [0, 256], sizes = [8, 256], strides = [1, 1]} : vector<8x512xf32> to vector<8x256xf32>
    %11 = arith.truncf %10 : vector<8x256xf32> to vector<8x256xbf16>
    %c0_6 = arith.constant 0 : index
    %c0_7 = arith.constant 0 : index
    %12 = vector.load %arg3[%c0_6, %c0_7] : memref<256x256xbf16, #tpu.memory_space<vmem>>, vector<256x256xbf16>
    %cst_8 = arith.constant dense<0.000000e+00> : vector<8x256xf32>
    %13 = tpu.matmul %9, %12, %cst_8 {dimension_numbers = #tpu.dot_dimension_numbers<[1], [0], [0], [1], [0, 0, 1, 1], [], []>} : vector<8x256xbf16>, vector<256x256xbf16>, vector<8x256xf32> -> vector<8x256xf32>
    %c1 = arith.constant 1 : index
    %c0_9 = arith.constant 0 : index
    %14 = vector.load %arg6[%c1, %c0_9] : memref<3x512xf32, #tpu.memory_space<vmem>>, vector<1x256xf32>
    %15 = vector.broadcast %14 : vector<1x256xf32> to vector<8x256xf32>
    %16 = arith.addf %13, %15 : vector<8x256xf32>
    %cst_10 = arith.constant 0.000000e+00 : f32
    %17 = vector.broadcast %cst_10 : f32 to vector<8x256xf32>
    %18 = arith.maximumf %16, %17 : vector<8x256xf32>
    %19 = arith.truncf %18 : vector<8x256xf32> to vector<8x256xbf16>
    %c0_11 = arith.constant 0 : index
    %c0_12 = arith.constant 0 : index
    %20 = vector.load %arg4[%c0_11, %c0_12] : memref<256x256xbf16, #tpu.memory_space<vmem>>, vector<256x256xbf16>
    %cst_13 = arith.constant dense<0.000000e+00> : vector<8x256xf32>
    %21 = tpu.matmul %11, %20, %cst_13 {dimension_numbers = #tpu.dot_dimension_numbers<[1], [0], [0], [1], [0, 0, 1, 1], [], []>} : vector<8x256xbf16>, vector<256x256xbf16>, vector<8x256xf32> -> vector<8x256xf32>
    %c1_14 = arith.constant 1 : index
    %c256 = arith.constant 256 : index
    %22 = vector.load %arg6[%c1_14, %c256] : memref<3x512xf32, #tpu.memory_space<vmem>>, vector<1x256xf32>
    %23 = vector.broadcast %22 : vector<1x256xf32> to vector<8x256xf32>
    %24 = arith.addf %21, %23 : vector<8x256xf32>
    %cst_15 = arith.constant 0.000000e+00 : f32
    %25 = vector.broadcast %cst_15 : f32 to vector<8x256xf32>
    %26 = arith.maximumf %24, %25 : vector<8x256xf32>
    %27 = arith.truncf %26 : vector<8x256xf32> to vector<8x256xbf16>
    %c0_16 = arith.constant 0 : index
    %c0_17 = arith.constant 0 : index
    %28 = vector.load %arg5[%c0_16, %c0_17] : memref<512x2xbf16, #tpu.memory_space<vmem>>, vector<256x2xbf16>
    %cst_18 = arith.constant dense<0.000000e+00> : vector<8x2xf32>
    %29 = tpu.matmul %19, %28, %cst_18 {dimension_numbers = #tpu.dot_dimension_numbers<[1], [0], [0], [1], [0, 0, 1, 1], [], []>} : vector<8x256xbf16>, vector<256x2xbf16>, vector<8x2xf32> -> vector<8x2xf32>
    %c256_19 = arith.constant 256 : index
    %c0_20 = arith.constant 0 : index
    %30 = vector.load %arg5[%c256_19, %c0_20] : memref<512x2xbf16, #tpu.memory_space<vmem>>, vector<256x2xbf16>
    %cst_21 = arith.constant dense<0.000000e+00> : vector<8x2xf32>
    %31 = tpu.matmul %27, %30, %cst_21 {dimension_numbers = #tpu.dot_dimension_numbers<[1], [0], [0], [1], [0, 0, 1, 1], [], []>} : vector<8x256xbf16>, vector<256x2xbf16>, vector<8x2xf32> -> vector<8x2xf32>
    %32 = arith.addf %29, %31 : vector<8x2xf32>
    %c2 = arith.constant 2 : index
    %c0_22 = arith.constant 0 : index
    %33 = vector.load %arg6[%c2, %c0_22] : memref<3x512xf32, #tpu.memory_space<vmem>>, vector<1x2xf32>
    %34 = vector.broadcast %33 : vector<1x2xf32> to vector<8x2xf32>
    %35 = arith.addf %32, %34 : vector<8x2xf32>
    %c0_23 = arith.constant 0 : index
    %c0_24 = arith.constant 0 : index
    %36 = vector.load %arg7[%c0_23, %c0_24] : memref<8x2xf32, #tpu.memory_space<vmem>>, vector<8x2xf32>
    tpu.vector_store %arg7[%c0_23, %c0_24], %35 {strides = array<i32>} : memref<8x2xf32, #tpu.memory_space<vmem>>, vector<8x2xf32>,
    return
  }
  func.func @transform_0(%arg0: i32) -> (i32, i32) {
    %c0_i32 = arith.constant 0 : i32
    %c0_i32_0 = arith.constant 0 : i32
    return %arg0, %c0_i32 : i32, i32
  }
  func.func @transform_1(%arg0: i32) -> (i32, i32) {
    %c0_i32 = arith.constant 0 : i32
    %c0_i32_0 = arith.constant 0 : i32
    %c0_i32_1 = arith.constant 0 : i32
    return %c0_i32, %c0_i32_0 : i32, i32
  }
  func.func @transform_2(%arg0: i32) -> (i32, i32) {
    %c0_i32 = arith.constant 0 : i32
    %c0_i32_0 = arith.constant 0 : i32
    %c0_i32_1 = arith.constant 0 : i32
    return %c0_i32, %c0_i32_0 : i32, i32
  }
  func.func @transform_3(%arg0: i32) -> (i32, i32) {
    %c0_i32 = arith.constant 0 : i32
    %c0_i32_0 = arith.constant 0 : i32
    %c0_i32_1 = arith.constant 0 : i32
    return %c0_i32, %c0_i32_0 : i32, i32
  }
  func.func @transform_4(%arg0: i32) -> (i32, i32) {
    %c0_i32 = arith.constant 0 : i32
    %c0_i32_0 = arith.constant 0 : i32
    %c0_i32_1 = arith.constant 0 : i32
    return %c0_i32, %c0_i32_0 : i32, i32
  }
  func.func @transform_5(%arg0: i32) -> (i32, i32) {
    %c0_i32 = arith.constant 0 : i32
    %c0_i32_0 = arith.constant 0 : i32
    %c0_i32_1 = arith.constant 0 : i32
    return %c0_i32, %c0_i32_0 : i32, i32
  }
  func.func @transform_6(%arg0: i32) -> (i32, i32) {
    %c0_i32 = arith.constant 0 : i32
    %c0_i32_0 = arith.constant 0 : i32
    return %arg0, %c0_i32 : i32, i32
  }
}

</mosaic_0001>

<bundles_post_ra>
// kernel: tpu_custom_call.1
= control target key start
LH: loop header
LB: loop body
LE: loop exit
PB: predicated region body
PF: predicated region fallthrough
CT: control target
= control target key end

     0   :  { %11 = vsyncpa [#allocation3], 0  ;;  %s1934_s0 = inlined_call_operand.vmem [shape: bf16[8,16], index: 0, kind: input, shape index: {}]   ;;  %s1935_s1 = inlined_call_operand.hbm [shape: bf16[16,512], index: 1, kind: input, shape index: {}]   ;;  %s1936_s2 = inlined_call_operand.vmem [shape: bf16[256,256], index: 2, kind: input, shape index: {}]   ;;  %s1937_s3 = inlined_call_operand.hbm [shape: bf16[256,256], index: 3, kind: input, shape index: {}]   ;;  %s1938_s4 = inlined_call_operand.vmem [shape: bf16[512,2], index: 4, kind: input, shape index: {}]   ;;  %s1939_s5 = inlined_call_operand.hbm [shape: f32[3,512], index: 5, kind: input, shape index: {}]   ;;  %s1940_s6 = inlined_call_operand.vmem [shape: f32[8,2], index: 6, kind: output, shape index: {}]  }
   0x1   :  { %12 = vsyncpa [#allocation5], 0  ;;  %s34_s23 = sshll.u32 %s1937_s3, 4  ;;  %s1585_s24 = smov [#allocation4]   ;;  %s35_s23 = int_to_ptr.hbm [resolvable:$true] %s34_s23 }
   0x2   :  { %s36_s25 = sshll.u32 %s1585_s24, 4  ;;  %s19_s28 = sshll.u32 %s1935_s1, 4  ;;  %s37_s25 = int_to_ptr.vmem [resolvable:$true] %s36_s25  ;;  %s20_s28 = int_to_ptr.hbm [resolvable:$true] %s19_s28 }
   0x3   :  { %s1586_s29 = smov 128   ;;  %s1587_s30 = smov 8  }
   0x4   :  { %42 = dma.hbm_to_vmem [thread:$0]  %s35_s23, 4096, %s37_s25, [#allocation5], %s1586_s29, %s1586_s29, %s1587_s30  }
   0x5   :  { %s1588_s7 = smov [#allocation2]   ;;  %s1589_s9 = smov 256  }
   0x6   :  { %s21_s8 = sshll.u32 %s1588_s7, 4  ;;  %s1590_s10 = smov 16   ;;  %s22_s8 = int_to_ptr.vmem [resolvable:$true] %s21_s8 }
   0x7   :  { %27 = dma.hbm_to_vmem [thread:$0]  %s20_s28, 512, %s22_s8, [#allocation3], %s1589_s9, %s1589_s9, %s1590_s10  }
   0x8   :  { %s50_s12 = sshll.u32 %s1939_s5, 4  ;;  %s1591_s13 = smov [#allocation6]   ;;  %s51_s12 = int_to_ptr.hbm [resolvable:$true] %s50_s12 }
   0x9   :  { %s52_s14 = sshll.u32 %s1591_s13, 4  ;;  %s53_s14 = int_to_ptr.vmem [resolvable:$true] %s52_s14 }
   0xa   :  { %55 = dma.hbm_to_vmem [thread:$0]  %s51_s12, 256, %s53_s14, [#allocation5]  }
   0xb   :  { %1581 = dma.done.wait [#allocation3], 512  }
   0xc   :  { %1582 = vsyncadd [#allocation3], 4294966784 }
   0xd   :  { %1583 = dma.done.wait [#allocation5], 4352  }
   0xe   :  { %1584 = vsyncadd [#allocation5], 4294962944  ;;  %vm104_vm0 = vcmask 130048   ;;  %v999_v0 = vld [vmem:[#allocation2] sm:$0xf]  ;;  %vm989_vm1 = vcmask 15360  }
   0xf   :  { %v1403_v1 = vld [vmem:[#allocation2 + $0xc] sm:$0xf0]  ;;  %v1401_v2 = vld [vmem:[#allocation2 + $0x4] sm:$0xf]  ;;  %v1001_v4 = vld [vmem:[#allocation2 + $0x10] sm:$0xf0] }
  0x10   :  { %v1000_v3 = vor.u32 %v1403_v1, %v999_v0  ;;  %v1007_v5 = vld [vmem:[#allocation2 + $0x8] sm:$0xf]  ;;  %v1404_v6 = vld [vmem:[#allocation2 + $0x14] sm:$0xf0]  ;;  %v1004_v7 = vor.u32 %v1401_v2, %v1001_v4  ;;  %v69_v9 = vld [vmem:[%s1934_s0] sm:$0xf] }
  0x11   :  { %v1008_v8 = vor.u32 %v1404_v6, %v1007_v5  ;;  %v1402_v10 = vld [vmem:[#allocation2 + $0xc] sm:$0xf]  ;;  %v1009_v11 = vld [vmem:[#allocation2 + $0x18] sm:$0xf0]  ;;  %v1075_v13 = vld [vmem:[%s1936_s2 + $0x70] sm:$0xf] }
  0x12   :  { %115 = vmatpush.bf16.msra.mxu0 %v1000_v3  ;;  %v1012_v12 = vor.u32 %v1402_v10, %v1009_v11  ;;  %v1420_v14 = vld [vmem:[%s1936_s2 + $0x74] sm:$0xf0]  ;;  %v1139_v15 = vld [vmem:[%s1936_s2 + $0xf0] sm:$0xf]  ;;  %128 = vmatpush.bf16.msra.mxu1 %v1004_v7  ;;  %v1419_v18 = vld [vmem:[%s1936_s2 + $0x74] sm:$0xf] }
  0x13   :  { %141 = vmatpush.bf16.msra.mxu2 %v1008_v8  ;;  %v1076_v16 = vor.u32 %v1420_v14, %v1075_v13  ;;  %v1436_v17 = vld [vmem:[%s1936_s2 + $0xf4] sm:$0xf0]  ;;  %v1077_v19 = vld [vmem:[%s1936_s2 + $0x78] sm:$0xf0]  ;;  %v1435_v22 = vld [vmem:[%s1936_s2 + $0xf4] sm:$0xf] }
  0x14   :  { %154 = vmatpush.bf16.msra.mxu3 %v1012_v12  ;;  %v1140_v20 = vor.u32 %v1436_v17, %v1139_v15  ;;  %v1080_v21 = vor.u32 %v1419_v18, %v1077_v19  ;;  %v1141_v23 = vld [vmem:[%s1936_s2 + $0xf8] sm:$0xf0]  ;;  %v1067_v24 = vld [vmem:[%s1936_s2 + $0x60] sm:$0xf]  ;;  %v1418_v26 = vld [vmem:[%s1936_s2 + $0x64] sm:$0xf0] }
  0x15   :  { %1013 = vmatmul.msk.bf16.vlgmr.msra.gmra.mxu0 %vm104_vm0, %v69_v9  ;;  %v1144_v25 = vor.u32 %v1435_v22, %v1141_v23  ;;  %v1131_v27 = vld [vmem:[%s1936_s2 + $0xe0] sm:$0xf]  ;;  %v1434_v28 = vld [vmem:[%s1936_s2 + $0xe4] sm:$0xf0]  ;;  %1014 = vmatmul.msk.bf16.vlgmr.msra.gmra.mxu1 %vm104_vm0, %v69_v9  ;;  %v1417_v29 = vld [vmem:[%s1936_s2 + $0x64] sm:$0xf]  ;;  %v1068_v32 = vor.u32 %v1418_v26, %v1067_v24 }
  0x16   :  { %1015 = vmatmul.msk.bf16.vlgmr.msra.gmra.mxu2 %vm104_vm0, %v69_v9  ;;  %v1069_v30 = vld [vmem:[%s1936_s2 + $0x68] sm:$0xf0]  ;;  %v1433_v31 = vld [vmem:[%s1936_s2 + $0xe4] sm:$0xf]  ;;  %367 = vmatpush.bf16.msrb.mxu0 %v1076_v16  ;;  %v1132_v34 = vor.u32 %v1434_v28, %v1131_v27  ;;  %v1059_v36 = vld [vmem:[%s1936_s2 + $0x50] sm:$0xf] }
  0x17   :  { %1016 = vmatmul.msk.bf16.vlgmr.msra.gmra.mxu3 %vm104_vm0, %v69_v9  ;;  %v1133_v33 = vld [vmem:[%s1936_s2 + $0xe8] sm:$0xf0]  ;;  %380 = vmatpush.bf16.msrb.mxu1 %v1140_v20  ;;  %v1072_v35 = vor.u32 %v1417_v29, %v1069_v30  ;;  %v1416_v37 = vld [vmem:[%s1936_s2 + $0x54] sm:$0xf0]  ;;  %v1123_v38 = vld [vmem:[%s1936_s2 + $0xd0] sm:$0xf] }
  0x18   :  { %393 = vmatpush.bf16.msrb.mxu2 %v1080_v21  ;;  %406 = vmatpush.bf16.msrb.mxu3 %v1144_v25  ;;  %v1136_v39 = vor.u32 %v1433_v31, %v1133_v33  ;;  %v1432_v40 = vld [vmem:[%s1936_s2 + $0xd4] sm:$0xf0]  ;;  %v1415_v41 = vld [vmem:[%s1936_s2 + $0x54] sm:$0xf]  ;;  %v1061_v42 = vld [vmem:[%s1936_s2 + $0x58] sm:$0xf0]  ;;  %v1060_v45 = vor.u32 %v1416_v37, %v1059_v36 }
  0x19   :  { %v1431_v43 = vld [vmem:[%s1936_s2 + $0xd4] sm:$0xf]  ;;  %v1125_v44 = vld [vmem:[%s1936_s2 + $0xd8] sm:$0xf0]  ;;  %v1124_v46 = vor.u32 %v1432_v40, %v1123_v38  ;;  %v1064_v47 = vor.u32 %v1415_v41, %v1061_v42  ;;  %v1051_v48 = vld [vmem:[%s1936_s2 + $0x40] sm:$0xf] }
  0x1a   :  { %368 = vmatpush.bf16.msrb.mxu0 %v1068_v32  ;;  %v1414_v49 = vld [vmem:[%s1936_s2 + $0x44] sm:$0xf0]  ;;  %v1115_v50 = vld [vmem:[%s1936_s2 + $0xc0] sm:$0xf]  ;;  %v1128_v51 = vor.u32 %v1431_v43, %v1125_v44  ;;  %v1413_v53 = vld [vmem:[%s1936_s2 + $0x44] sm:$0xf] }
  0x1b   :  { %381 = vmatpush.bf16.msrb.mxu1 %v1132_v34  ;;  %v1430_v52 = vld [vmem:[%s1936_s2 + $0xc4] sm:$0xf0]  ;;  %v1053_v54 = vld [vmem:[%s1936_s2 + $0x48] sm:$0xf0]  ;;  %v1429_v55 = vld [vmem:[%s1936_s2 + $0xc4] sm:$0xf]  ;;  %v1052_v57 = vor.u32 %v1414_v49, %v1051_v48 }
  0x1c   :  { %394 = vmatpush.bf16.msrb.mxu2 %v1072_v35  ;;  %407 = vmatpush.bf16.msrb.mxu3 %v1136_v39  ;;  %v1117_v56 = vld [vmem:[%s1936_s2 + $0xc8] sm:$0xf0]  ;;  %v1116_v58 = vor.u32 %v1430_v52, %v1115_v50  ;;  %v1056_v59 = vor.u32 %v1413_v53, %v1053_v54  ;;  %v1043_v60 = vld [vmem:[%s1936_s2 + $0x30] sm:$0xf]  ;;  %v1412_v61 = vld [vmem:[%s1936_s2 + $0x34] sm:$0xf0] }
  0x1d   :  { %v1107_v62 = vld [vmem:[%s1936_s2 + $0xb0] sm:$0xf]  ;;  %v1120_v63 = vor.u32 %v1429_v55, %v1117_v56  ;;  %v1428_v0 = vld [vmem:[%s1936_s2 + $0xb4] sm:$0xf0]  ;;  %v1411_v1 = vld [vmem:[%s1936_s2 + $0x34] sm:$0xf]  ;;  %v1044_v5 = vor.u32 %v1412_v61, %v1043_v60 }
  0x1e   :  { %369 = vmatpush.bf16.msrb.mxu0 %v1060_v45  ;;  %v1045_v2 = vld [vmem:[%s1936_s2 + $0x38] sm:$0xf0]  ;;  %v1427_v3 = vld [vmem:[%s1936_s2 + $0xb4] sm:$0xf]  ;;  %v1108_v6 = vor.u32 %v1428_v0, %v1107_v62  ;;  %v1035_v8 = vld [vmem:[%s1936_s2 + $0x20] sm:$0xf] }
  0x1f   :  { %382 = vmatpush.bf16.msrb.mxu1 %v1124_v46  ;;  %v1109_v4 = vld [vmem:[%s1936_s2 + $0xb8] sm:$0xf0]  ;;  %v1048_v7 = vor.u32 %v1411_v1, %v1045_v2  ;;  %v1410_v9 = vld [vmem:[%s1936_s2 + $0x24] sm:$0xf0]  ;;  %v1099_v10 = vld [vmem:[%s1936_s2 + $0xa0] sm:$0xf] }
  0x20   :  { %395 = vmatpush.bf16.msrb.mxu2 %v1064_v47  ;;  %408 = vmatpush.bf16.msrb.mxu3 %v1128_v51  ;;  %v1112_v11 = vor.u32 %v1427_v3, %v1109_v4  ;;  %v1426_v12 = vld [vmem:[%s1936_s2 + $0xa4] sm:$0xf0]  ;;  %v1409_v13 = vld [vmem:[%s1936_s2 + $0x24] sm:$0xf]  ;;  %v1037_v14 = vld [vmem:[%s1936_s2 + $0x28] sm:$0xf0]  ;;  %v1036_v17 = vor.u32 %v1410_v9, %v1035_v8 }
  0x21   :  { %v1425_v15 = vld [vmem:[%s1936_s2 + $0xa4] sm:$0xf]  ;;  %v1101_v16 = vld [vmem:[%s1936_s2 + $0xa8] sm:$0xf0]  ;;  %v1100_v18 = vor.u32 %v1426_v12, %v1099_v10  ;;  %v1040_v19 = vor.u32 %v1409_v13, %v1037_v14  ;;  %v1027_v20 = vld [vmem:[%s1936_s2 + $0x10] sm:$0xf] }
  0x22   :  { %370 = vmatpush.bf16.msrb.mxu0 %v1052_v57  ;;  %v1408_v21 = vld [vmem:[%s1936_s2 + $0x14] sm:$0xf0]  ;;  %v1091_v22 = vld [vmem:[%s1936_s2 + $0x90] sm:$0xf]  ;;  %v1104_v23 = vor.u32 %v1425_v15, %v1101_v16  ;;  %v1407_v25 = vld [vmem:[%s1936_s2 + $0x14] sm:$0xf] }
  0x23   :  { %383 = vmatpush.bf16.msrb.mxu1 %v1116_v58  ;;  %v1424_v24 = vld [vmem:[%s1936_s2 + $0x94] sm:$0xf0]  ;;  %v1029_v26 = vld [vmem:[%s1936_s2 + $0x18] sm:$0xf0]  ;;  %v1423_v27 = vld [vmem:[%s1936_s2 + $0x94] sm:$0xf]  ;;  %v1028_v29 = vor.u32 %v1408_v21, %v1027_v20 }
  0x24   :  { %396 = vmatpush.bf16.msrb.mxu2 %v1056_v59  ;;  %409 = vmatpush.bf16.msrb.mxu3 %v1120_v63  ;;  %v1093_v28 = vld [vmem:[%s1936_s2 + $0x98] sm:$0xf0]  ;;  %v1019_v30 = vld [vmem:[%s1936_s2] sm:$0xf]  ;;  %v1406_v31 = vld [vmem:[%s1936_s2 + $0x4] sm:$0xf0]  ;;  %v1092_v33 = vor.u32 %v1424_v24, %v1091_v22  ;;  %v1032_v34 = vor.u32 %v1407_v25, %v1029_v26 }
  0x25   :  { %v1083_v32 = vld [vmem:[%s1936_s2 + $0x80] sm:$0xf]  ;;  %v1422_v35 = vld [vmem:[%s1936_s2 + $0x84] sm:$0xf0]  ;;  %v1405_v36 = vld [vmem:[%s1936_s2 + $0x4] sm:$0xf]  ;;  %v1096_v37 = vor.u32 %v1423_v27, %v1093_v28  ;;  %v1020_v44 = vor.u32 %v1406_v31, %v1019_v30 }
  0x26   :  { %371 = vmatpush.bf16.msrb.mxu0 %v1044_v5  ;;  %v1021_v38 = vld [vmem:[%s1936_s2 + $0x8] sm:$0xf0]  ;;  %v1421_v39 = vld [vmem:[%s1936_s2 + $0x84] sm:$0xf]  ;;  %v1203_v41 = vld [vmem:[#allocation4 + $0x70] sm:$0xf]  ;;  %v1084_v48 = vor.u32 %v1422_v35, %v1083_v32 }
  0x27   :  { %384 = vmatpush.bf16.msrb.mxu1 %v1108_v6  ;;  %v1085_v40 = vld [vmem:[%s1936_s2 + $0x88] sm:$0xf0]  ;;  %v1452_v42 = vld [vmem:[#allocation4 + $0x74] sm:$0xf0]  ;;  %v1267_v43 = vld [vmem:[#allocation4 + $0xf0] sm:$0xf]  ;;  %v1024_v49 = vor.u32 %v1405_v36, %v1021_v38 }
  0x28   :  { %397 = vmatpush.bf16.msrb.mxu2 %v1048_v7  ;;  %410 = vmatpush.bf16.msrb.mxu3 %v1112_v11  ;;  %v1468_v45 = vld [vmem:[#allocation4 + $0xf4] sm:$0xf0]  ;;  %v1451_v46 = vld [vmem:[#allocation4 + $0x74] sm:$0xf]  ;;  %v1205_v47 = vld [vmem:[#allocation4 + $0x78] sm:$0xf0]  ;;  %v1088_v52 = vor.u32 %v1421_v39, %v1085_v40  ;;  %v1204_v53 = vor.u32 %v1452_v42, %v1203_v41 }
  0x29   :  { %v1467_v50 = vld [vmem:[#allocation4 + $0xf4] sm:$0xf]  ;;  %v1269_v51 = vld [vmem:[#allocation4 + $0xf8] sm:$0xf0]  ;;  %v1268_v54 = vor.u32 %v1468_v45, %v1267_v43  ;;  %v1208_v55 = vor.u32 %v1451_v46, %v1205_v47  ;;  %v1195_v56 = vld [vmem:[#allocation4 + $0x60] sm:$0xf] }
  0x2a   :  { %372 = vmatpush.bf16.msrb.mxu0 %v1036_v17  ;;  %v1450_v57 = vld [vmem:[#allocation4 + $0x64] sm:$0xf0]  ;;  %v1259_v58 = vld [vmem:[#allocation4 + $0xe0] sm:$0xf]  ;;  %v1272_v59 = vor.u32 %v1467_v50, %v1269_v51  ;;  %v1449_v61 = vld [vmem:[#allocation4 + $0x64] sm:$0xf] }
  0x2b   :  { %385 = vmatpush.bf16.msrb.mxu1 %v1100_v18  ;;  %v1466_v60 = vld [vmem:[#allocation4 + $0xe4] sm:$0xf0]  ;;  %v1197_v62 = vld [vmem:[#allocation4 + $0x68] sm:$0xf0]  ;;  %v1465_v63 = vld [vmem:[#allocation4 + $0xe4] sm:$0xf]  ;;  %v1196_v1 = vor.u32 %v1450_v57, %v1195_v56 }
  0x2c   :  { %398 = vmatpush.bf16.msrb.mxu2 %v1040_v19  ;;  %411 = vmatpush.bf16.msrb.mxu3 %v1104_v23  ;;  %v1261_v0 = vld [vmem:[#allocation4 + $0xe8] sm:$0xf0]  ;;  %v1260_v2 = vor.u32 %v1466_v60, %v1259_v58  ;;  %v1200_v3 = vor.u32 %v1449_v61, %v1197_v62  ;;  %v1187_v5 = vld [vmem:[#allocation4 + $0x50] sm:$0xf]  ;;  %v1448_v6 = vld [vmem:[#allocation4 + $0x54] sm:$0xf0] }
  0x2d   :  { %v1264_v4 = vor.u32 %v1465_v63, %v1261_v0  ;;  %v1251_v7 = vld [vmem:[#allocation4 + $0xd0] sm:$0xf]  ;;  %v1188_v8 = vor.u32 %v1448_v6, %v1187_v5  ;;  %v1464_v9 = vld [vmem:[#allocation4 + $0xd4] sm:$0xf0]  ;;  %v1447_v10 = vld [vmem:[#allocation4 + $0x54] sm:$0xf] }
  0x2e   :  { %373 = vmatpush.bf16.msrb.mxu0 %v1028_v29  ;;  %v1189_v11 = vld [vmem:[#allocation4 + $0x58] sm:$0xf0]  ;;  %v1252_v12 = vor.u32 %v1464_v9, %v1251_v7  ;;  %v1463_v14 = vld [vmem:[#allocation4 + $0xd4] sm:$0xf]  ;;  %v1179_v17 = vld [vmem:[#allocation4 + $0x40] sm:$0xf] }
  0x2f   :  { %386 = vmatpush.bf16.msrb.mxu1 %v1092_v33  ;;  %v1192_v13 = vor.u32 %v1447_v10, %v1189_v11  ;;  %v1253_v15 = vld [vmem:[#allocation4 + $0xd8] sm:$0xf0]  ;;  %v1446_v18 = vld [vmem:[#allocation4 + $0x44] sm:$0xf0]  ;;  %v1243_v19 = vld [vmem:[#allocation4 + $0xc0] sm:$0xf] }
  0x30   :  { %399 = vmatpush.bf16.msrb.mxu2 %v1032_v34  ;;  %412 = vmatpush.bf16.msrb.mxu3 %v1096_v37  ;;  %v1256_v16 = vor.u32 %v1463_v14, %v1253_v15  ;;  %v1180_v20 = vor.u32 %v1446_v18, %v1179_v17  ;;  %v1462_v21 = vld [vmem:[#allocation4 + $0xc4] sm:$0xf0]  ;;  %v1445_v22 = vld [vmem:[#allocation4 + $0x44] sm:$0xf]  ;;  %v1181_v23 = vld [vmem:[#allocation4 + $0x48] sm:$0xf0] }
  0x31   :  { %v1244_v24 = vor.u32 %v1462_v21, %v1243_v19  ;;  %v1184_v25 = vor.u32 %v1445_v22, %v1181_v23  ;;  %v1461_v26 = vld [vmem:[#allocation4 + $0xc4] sm:$0xf]  ;;  %v1245_v27 = vld [vmem:[#allocation4 + $0xc8] sm:$0xf0]  ;;  %v1171_v29 = vld [vmem:[#allocation4 + $0x30] sm:$0xf] }
  0x32   :  { %374 = vmatpush.bf16.msrb.mxu0 %v1020_v44  ;;  %v1248_v28 = vor.u32 %v1461_v26, %v1245_v27  ;;  %v1444_v30 = vld [vmem:[#allocation4 + $0x34] sm:$0xf0]  ;;  %v1235_v31 = vld [vmem:[#allocation4 + $0xb0] sm:$0xf]  ;;  %v1443_v34 = vld [vmem:[#allocation4 + $0x34] sm:$0xf] }
  0x33   :  { %387 = vmatpush.bf16.msrb.mxu1 %v1084_v48  ;;  %v1172_v32 = vor.u32 %v1444_v30, %v1171_v29  ;;  %v1460_v33 = vld [vmem:[#allocation4 + $0xb4] sm:$0xf0]  ;;  %v1173_v35 = vld [vmem:[#allocation4 + $0x38] sm:$0xf0]  ;;  %v1459_v38 = vld [vmem:[#allocation4 + $0xb4] sm:$0xf] }
  0x34   :  { %400 = vmatpush.bf16.msrb.mxu2 %v1024_v49  ;;  %413 = vmatpush.bf16.msrb.mxu3 %v1088_v52  ;;  %v1236_v36 = vor.u32 %v1460_v33, %v1235_v31  ;;  %v1176_v37 = vor.u32 %v1443_v34, %v1173_v35  ;;  %v1237_v39 = vld [vmem:[#allocation4 + $0xb8] sm:$0xf0]  ;;  %v1163_v41 = vld [vmem:[#allocation4 + $0x20] sm:$0xf]  ;;  %v1442_v42 = vld [vmem:[#allocation4 + $0x24] sm:$0xf0] }
  0x35   :  { %v1240_v40 = vor.u32 %v1459_v38, %v1237_v39  ;;  %v1227_v43 = vld [vmem:[#allocation4 + $0xa0] sm:$0xf]  ;;  %v1164_v44 = vor.u32 %v1442_v42, %v1163_v41  ;;  %v1458_v45 = vld [vmem:[#allocation4 + $0xa4] sm:$0xf0]  ;;  %v1441_v46 = vld [vmem:[#allocation4 + $0x24] sm:$0xf] }
  0x36   :  { %622 = vmatpush.bf16.msra.mxu0 %v1204_v53  ;;  %v1165_v47 = vld [vmem:[#allocation4 + $0x28] sm:$0xf0]  ;;  %v1228_v48 = vor.u32 %v1458_v45, %v1227_v43  ;;  %v1457_v50 = vld [vmem:[#allocation4 + $0xa4] sm:$0xf]  ;;  %v1155_v53 = vld [vmem:[#allocation4 + $0x10] sm:$0xf] }
  0x37   :  { %635 = vmatpush.bf16.msra.mxu1 %v1268_v54  ;;  %v1168_v49 = vor.u32 %v1441_v46, %v1165_v47  ;;  %v1229_v51 = vld [vmem:[#allocation4 + $0xa8] sm:$0xf0]  ;;  %v1440_v54 = vld [vmem:[#allocation4 + $0x14] sm:$0xf0]  ;;  %v1439_v58 = vld [vmem:[#allocation4 + $0x14] sm:$0xf] }
  0x38   :  { %648 = vmatpush.bf16.msra.mxu2 %v1208_v55  ;;  %661 = vmatpush.bf16.msra.mxu3 %v1272_v59  ;;  %v1232_v52 = vor.u32 %v1457_v50, %v1229_v51  ;;  %v1219_v55 = vld [vmem:[#allocation4 + $0x90] sm:$0xf]  ;;  %v1156_v56 = vor.u32 %v1440_v54, %v1155_v53  ;;  %v1456_v57 = vld [vmem:[#allocation4 + $0x94] sm:$0xf0]  ;;  %v1157_v59 = vld [vmem:[#allocation4 + $0x18] sm:$0xf0] }
  0x39   :  { %v1220_v60 = vor.u32 %v1456_v57, %v1219_v55  ;;  %v1160_v61 = vor.u32 %v1439_v58, %v1157_v59  ;;  %v1455_v62 = vld [vmem:[#allocation4 + $0x94] sm:$0xf]  ;;  %v1221_v63 = vld [vmem:[#allocation4 + $0x98] sm:$0xf0]  ;;  %v1147_v0 = vld [vmem:[#allocation4] sm:$0xf] }
  0x3a   :  { %623 = vmatpush.bf16.msra.mxu0 %v1196_v1  ;;  %v1224_v1 = vor.u32 %v1455_v62, %v1221_v63  ;;  %v1437_v7 = vld [vmem:[#allocation4 + $0x4] sm:$0xf]  ;;  %v1213_v11 = vld [vmem:[#allocation4 + $0x88] sm:$0xf0]  ;;  %v1476_v23 = vld [vmem:[%s1938_s4 + $0x38] sm:$0xff] }
  0x3b   :  { %636 = vmatpush.bf16.msra.mxu1 %v1260_v2  ;;  %v1438_v2 = vld [vmem:[#allocation4 + $0x4] sm:$0xf0]  ;;  %v1453_v9 = vld [vmem:[#allocation4 + $0x84] sm:$0xf]  ;;  %v1492_v26 = vld [vmem:[%s1938_s4 + $0xb8] sm:$0xff] }
  0x3c   :  { %649 = vmatpush.bf16.msra.mxu2 %v1200_v3  ;;  %662 = vmatpush.bf16.msra.mxu3 %v1264_v4  ;;  %v1211_v3 = vld [vmem:[#allocation4 + $0x80] sm:$0xf]  ;;  %v1454_v4 = vld [vmem:[#allocation4 + $0x84] sm:$0xf0]  ;;  %v1148_v5 = vor.u32 %v1438_v2, %v1147_v0  ;;  %v1475_v33 = vld [vmem:[%s1938_s4 + $0x30] sm:$0xff] }
  0x3d   :  { %v1212_v6 = vor.u32 %v1454_v4, %v1211_v3  ;;  %v1483_v34 = vld [vmem:[%s1938_s4 + $0x70] sm:$0xff]  ;;  %v1474_v38 = vld [vmem:[%s1938_s4 + $0x28] sm:$0xff]  ;;  %v1481_v45 = vld [vmem:[%s1938_s4 + $0x60] sm:$0xff] }
  0x3e   :  { %624 = vmatpush.bf16.msra.mxu0 %v1188_v8  ;;  %v1149_v8 = vld [vmem:[#allocation4 + $0x8] sm:$0xf0]  ;;  %v1491_v35 = vld [vmem:[%s1938_s4 + $0xb0] sm:$0xff]  ;;  %v1500_v50 = vld [vmem:[%s1938_s4 + $0xf8] sm:$0xff] }
  0x3f   :  { %637 = vmatpush.bf16.msra.mxu1 %v1252_v12  ;;  %v1152_v10 = vor.u32 %v1437_v7, %v1149_v8  ;;  %v1216_v12 = vor.u32 %v1453_v9, %v1213_v11  ;;  %v1482_v39 = vld [vmem:[%s1938_s4 + $0x68] sm:$0xff]  ;;  %v1480_v51 = vld [vmem:[%s1938_s4 + $0x58] sm:$0xff]  ;;  %v1499_v54 = vld [vmem:[%s1938_s4 + $0xf0] sm:$0xff] }
  0x40   :  { %650 = vmatpush.bf16.msra.mxu2 %v1192_v13  ;;  %663 = vmatpush.bf16.msra.mxu3 %v1256_v16  ;;  %v74_v13 = vld [vmem:[#allocation6] ss:$4 sm:$0xf]  ;;  %v1479_v55 = vld [vmem:[%s1938_s4 + $0x50] sm:$0xff]  ;;  %v1496_v0 = vld [vmem:[%s1938_s4 + $0xd8] sm:$0xff] }
  0x41   :  { %v76_v14 = vperm.slane %v74_v13, 0  ;;  %v77_v15 = vperm.slane %v74_v13, 1  ;;  %v78_v27 = vperm.slane %v74_v13, 2  ;;  %v79_v30 = vperm.slane %v74_v13, 3  ;;  %v1470_v53 = vld [vmem:[%s1938_s4 + $0x8] sm:$0xff]  ;;  %v1469_v57 = vld [vmem:[%s1938_s4] sm:$0xff] }
  0x42   :  { %625 = vmatpush.bf16.msra.mxu0 %v1180_v20  ;;  %v1498_v58 = vld [vmem:[%s1938_s4 + $0xe8] sm:$0xff]  ;;  %v1477_v62 = vld [vmem:[%s1938_s4 + $0x40] sm:$0xff]  ;;  %v1487_v63 = vld [vmem:[%s1938_s4 + $0x90] sm:$0xff] }
  0x43   :  { %638 = vmatpush.bf16.msra.mxu1 %v1244_v24  ;;  %v1484_v24 = vld [vmem:[%s1938_s4 + $0x78] sm:$0xff]  ;;  %v1478_v59 = vld [vmem:[%s1938_s4 + $0x48] sm:$0xff]  ;;  %v1495_v2 = vld [vmem:[%s1938_s4 + $0xd0] sm:$0xff] }
  0x44   :  { %651 = vmatpush.bf16.msra.mxu2 %v1184_v25  ;;  %664 = vmatpush.bf16.msra.mxu3 %v1248_v28  ;;  %v1485_v3 = vld [vmem:[%s1938_s4 + $0x80] sm:$0xff]  ;;  %v1494_v4 = vld [vmem:[%s1938_s4 + $0xc8] sm:$0xff] }
  0x46   :  { %626 = vmatpush.bf16.msra.mxu0 %v1172_v32 }
  0x47   :  { %639 = vmatpush.bf16.msra.mxu1 %v1236_v36 }
  0x48   :  { %652 = vmatpush.bf16.msra.mxu2 %v1176_v37  ;;  %665 = vmatpush.bf16.msra.mxu3 %v1240_v40 }
  0x4a   :  { %627 = vmatpush.bf16.msra.mxu0 %v1164_v44  ;;  %v1473_v44 = vld [vmem:[%s1938_s4 + $0x20] sm:$0xff] }
  0x4b   :  { %640 = vmatpush.bf16.msra.mxu1 %v1228_v48  ;;  %v1472_v48 = vld [vmem:[%s1938_s4 + $0x18] sm:$0xff] }
  0x4c   :  { %653 = vmatpush.bf16.msra.mxu2 %v1168_v49  ;;  %666 = vmatpush.bf16.msra.mxu3 %v1232_v52  ;;  %v1471_v49 = vld [vmem:[%s1938_s4 + $0x10] sm:$0xff]  ;;  %v1490_v52 = vld [vmem:[%s1938_s4 + $0xa8] sm:$0xff] }
  0x4e   :  { %628 = vmatpush.bf16.msra.mxu0 %v1156_v56  ;;  %v1489_v56 = vld [vmem:[%s1938_s4 + $0xa0] sm:$0xff] }
  0x4f   :  { %641 = vmatpush.bf16.msra.mxu1 %v1220_v60  ;;  %v1488_v60 = vld [vmem:[%s1938_s4 + $0x98] sm:$0xff] }
  0x50   :  { %654 = vmatpush.bf16.msra.mxu2 %v1160_v61  ;;  %667 = vmatpush.bf16.msra.mxu3 %v1224_v1  ;;  %v1497_v61 = vld [vmem:[%s1938_s4 + $0xe0] sm:$0xff]  ;;  %v1486_v1 = vld [vmem:[%s1938_s4 + $0x88] sm:$0xff] }
  0x52   :  { %629 = vmatpush.bf16.msra.mxu0 %v1148_v5  ;;  %v201_v5 = vld [vmem:[#allocation6 + $0x1] ss:$4 sm:$0x3] }
  0x53   :  { %642 = vmatpush.bf16.msra.mxu1 %v1212_v6  ;;  %v1493_v6 = vld [vmem:[%s1938_s4 + $0xc0] sm:$0xff]  ;;  %v203_v7 = vperm.slane %v201_v5, 0 }
  0x54   :  { %655 = vmatpush.bf16.msra.mxu2 %v1152_v10  ;;  %668 = vmatpush.bf16.msra.mxu3 %v1216_v12  ;;  %v204_v12 = vperm.slane %v201_v5, 1 }
  0x92   :  { %v117_v16 = vpop.f32.mrf.mxu0  ;;  %v130_v18 = vpop.f32.mrf.mxu1 }
  0x93   :  { %v118_v17 = vadd.f32 %v117_v16, %v76_v14  ;;  %v131_v19 = vadd.f32 %v130_v18, %v77_v15 }
  0x95   :  { %v160_v20 = vmax.f32 %v118_v17, 0.0  ;;  %v161_v21 = vmax.f32 %v131_v19, 0.0 }
  0x97   :  { %v164_v22 = vpack.c.bf16 %v160_v20, %v160_v20  ;;  %v165_v25 = vpack.c.bf16 %v161_v21, %v161_v21  ;;  %v456_v21 = vld [vmem:[#allocation6 + $0x9] ss:$4 sm:$0x3] }
  0x99   :  { %375 = vmatmul.bf16.vlgmr.msrb.gmra.mxu0 %v164_v22  ;;  %401 = vmatmul.bf16.vlgmr.msrb.gmra.mxu2 %v164_v22  ;;  %v143_v28 = vpop.f32.mrf.mxu2 }
  0x9a   :  { %388 = vmatmul.bf16.vlgmr.msrb.gmra.mxu1 %v165_v25  ;;  %414 = vmatmul.bf16.vlgmr.msrb.gmra.mxu3 %v165_v25  ;;  %v119_v29 = vpop.f32.mrf.mxu0  ;;  %v156_v31 = vpop.f32.mrf.mxu3  ;;  %v144_v36 = vadd.f32 %v143_v28, %v78_v27 }
  0x9b   :  { %v132_v32 = vpop.f32.mrf.mxu1  ;;  %960 = vmatpush.bf16.msrb.mxu2 %v1476_v23  ;;  %973 = vmatpush.bf16.msrb.mxu3 %v1484_v24  ;;  %v157_v37 = vadd.f32 %v156_v31, %v79_v30  ;;  %v458_v24 = vperm.slane %v456_v21, 0  ;;  %v459_v31 = vperm.slane %v456_v21, 1 }
  0x9c   :  { %838 = vmatpush.bf16.msrb.mxu0 %v1492_v26  ;;  %v162_v40 = vmax.f32 %v144_v36, 0.0  ;;  %851 = vmatpush.bf16.msrb.mxu1 %v1500_v50 }
  0x9d   :  { %v163_v42 = vmax.f32 %v157_v37, 0.0 }
  0x9e   :  { %v166_v46 = vpack.c.bf16 %v162_v40, %v162_v40 }
  0x9f   :  { %961 = vmatpush.bf16.msrb.mxu2 %v1475_v33  ;;  %974 = vmatpush.bf16.msrb.mxu3 %v1483_v34  ;;  %v167_v47 = vpack.c.bf16 %v163_v42, %v163_v42 }
  0xa0   :  { %839 = vmatpush.bf16.msrb.mxu0 %v1491_v35  ;;  %852 = vmatpush.bf16.msrb.mxu1 %v1499_v54 }
  0xa1   :  { %v145_v41 = vpop.f32.mrf.mxu2 }
  0xa2   :  { %v158_v43 = vpop.f32.mrf.mxu3 }
  0xa3   :  { %962 = vmatpush.bf16.msrb.mxu2 %v1474_v38  ;;  %975 = vmatpush.bf16.msrb.mxu3 %v1482_v39 }
  0xa4   :  { %840 = vmatpush.bf16.msrb.mxu0 %v1490_v52  ;;  %853 = vmatpush.bf16.msrb.mxu1 %v1498_v58 }
  0xa7   :  { %963 = vmatpush.bf16.msrb.mxu2 %v1473_v44  ;;  %976 = vmatpush.bf16.msrb.mxu3 %v1481_v45 }
  0xa8   :  { %841 = vmatpush.bf16.msrb.mxu0 %v1489_v56  ;;  %854 = vmatpush.bf16.msrb.mxu1 %v1497_v61 }
  0xa9   :  { %630 = vmatmul.bf16.vlgmr.msra.gmra.mxu0 %v166_v46  ;;  %656 = vmatmul.bf16.vlgmr.msra.gmra.mxu2 %v166_v46 }
  0xaa   :  { %643 = vmatmul.bf16.vlgmr.msra.gmra.mxu1 %v167_v47  ;;  %669 = vmatmul.bf16.vlgmr.msra.gmra.mxu3 %v167_v47 }
  0xab   :  { %964 = vmatpush.bf16.msrb.mxu2 %v1472_v48  ;;  %977 = vmatpush.bf16.msrb.mxu3 %v1480_v51 }
  0xac   :  { %842 = vmatpush.bf16.msrb.mxu0 %v1488_v60  ;;  %855 = vmatpush.bf16.msrb.mxu1 %v1496_v0 }
  0xaf   :  { %965 = vmatpush.bf16.msrb.mxu2 %v1471_v49  ;;  %978 = vmatpush.bf16.msrb.mxu3 %v1479_v55 }
  0xb0   :  { %843 = vmatpush.bf16.msrb.mxu0 %v1487_v63  ;;  %856 = vmatpush.bf16.msrb.mxu1 %v1495_v2 }
  0xb3   :  { %966 = vmatpush.bf16.msrb.mxu2 %v1470_v53  ;;  %979 = vmatpush.bf16.msrb.mxu3 %v1478_v59  ;;  %v1508_v53 = vld [vmem:[#allocation6 + $0x2] ss:$0 sm:$0xff] }
  0xb4   :  { %844 = vmatpush.bf16.msrb.mxu0 %v1486_v1  ;;  %857 = vmatpush.bf16.msrb.mxu1 %v1494_v4 }
  0xb7   :  { %967 = vmatpush.bf16.msrb.mxu2 %v1469_v57  ;;  %980 = vmatpush.bf16.msrb.mxu3 %v1477_v62 }
  0xb8   :  { %845 = vmatpush.bf16.msrb.mxu0 %v1485_v3  ;;  %858 = vmatpush.bf16.msrb.mxu1 %v1493_v6 }
 0x116   :  { %v376_v8 = vpop.f32.mrf.mxu0 }
 0x117   :  { %v377_v9 = vadd.f32 %v376_v8, %v203_v7  ;;  %v389_v10 = vpop.f32.mrf.mxu1 }
 0x119   :  { %v390_v11 = vadd.f32 %v389_v10, %v377_v9 }
 0x11b   :  { %v419_v13 = vmax.f32 %v390_v11, 0.0 }
 0x11c   :  { %v402_v14 = vpop.f32.mrf.mxu2 }
 0x11d   :  { %v421_v15 = vpack.c.bf16 %v419_v13, %v419_v13  ;;  %v403_v16 = vadd.f32 %v402_v14, %v204_v12  ;;  %v415_v17 = vpop.f32.mrf.mxu3 }
 0x11e   :  { %v378_v18 = vpop.f32.mrf.mxu0 }
 0x11f   :  { %v416_v19 = vadd.f32 %v415_v17, %v403_v16  ;;  %v391_v20 = vpop.f32.mrf.mxu1  ;;  %968 = vmatmul.bf16.vlgmr.msrb.gmra.mxu2 %v421_v15 }
 0x121   :  { %v420_v22 = vmax.f32 %v416_v19, 0.0 }
 0x123   :  { %v422_v23 = vpack.c.bf16 %v420_v22, %v420_v22 }
 0x124   :  { %v404_v25 = vpop.f32.mrf.mxu2 }
 0x125   :  { %v417_v26 = vpop.f32.mrf.mxu3  ;;  %981 = vmatmul.bf16.vlgmr.msrb.gmra.mxu3 %v422_v23 }
 0x126   :  { %v631_v27 = vpop.f32.mrf.mxu0 }
 0x127   :  { %v632_v28 = vadd.f32 %v631_v27, %v458_v24  ;;  %v644_v29 = vpop.f32.mrf.mxu1 }
 0x129   :  { %v645_v30 = vadd.f32 %v644_v29, %v632_v28 }
 0x12b   :  { %v674_v32 = vmax.f32 %v645_v30, 0.0 }
 0x12c   :  { %v657_v33 = vpop.f32.mrf.mxu2 }
 0x12d   :  { %v676_v34 = vpack.c.bf16 %v674_v32, %v674_v32  ;;  %v658_v35 = vadd.f32 %v657_v33, %v459_v31  ;;  %v670_v36 = vpop.f32.mrf.mxu3 }
 0x12e   :  { %v633_v37 = vpop.f32.mrf.mxu0 }
 0x12f   :  { %v671_v38 = vadd.f32 %v670_v36, %v658_v35  ;;  %v646_v39 = vpop.f32.mrf.mxu1  ;;  %846 = vmatmul.bf16.vlgmr.msrb.gmra.mxu0 %v676_v34 }
 0x131   :  { %v675_v40 = vmax.f32 %v671_v38, 0.0 }
 0x133   :  { %v677_v41 = vpack.c.bf16 %v675_v40, %v675_v40 }
 0x134   :  { %v659_v42 = vpop.f32.mrf.mxu2 }
 0x135   :  { %v672_v43 = vpop.f32.mrf.mxu3  ;;  %859 = vmatmul.bf16.vlgmr.msrb.gmra.mxu1 %v677_v41 }
 0x1a2   :  { %v969_v44 = vpop.f32.mrf.mxu2 }
 0x1a8   :  { %v982_v45 = vpop.f32.mrf.mxu3 }
 0x1aa   :  { %v971_v46 = vpop.f32.mrf.mxu2 }
 0x1ac   :  { %v847_v47 = vpop.f32.mrf.mxu0 }
 0x1b0   :  { %v984_v48 = vpop.f32.mrf.mxu3 }
 0x1b2   :  { %v860_v49 = vpop.f32.mrf.mxu1 }
 0x1b3   :  { %v861_v50 = vadd.f32 %v860_v49, %v847_v47 }
 0x1b4   :  { %v849_v51 = vpop.f32.mrf.mxu0 }
 0x1b5   :  { %v970_v52 = vadd.f32 %v969_v44, %v861_v50 }
 0x1b7   :  { %v983_v54 = vadd.f32 %v982_v45, %v970_v52 }
 0x1b9   :  { %v988_v55 = vadd.f32 %v1508_v53, %v983_v54 }
 0x1ba   :  { %v862_v56 = vpop.f32.mrf.mxu1 }
 0x1bb   :  { %990 = vst.msk [vmem:[%s1940_s6] sm:$0xff] %vm989_vm1, %v988_v55 }
 0x1bc   :  { %995 = vsyncpa [#allocation3], 1 }
 0x1bd   :  { %996 = vsyncpa [#allocation5], 1 }

</bundles_post_ra>
